<compile_context>
chip_gen: v7x
topology: tpu7x:2x2x1
jax: 0.10.0
libtpu: 0.0.40
codegen_flags: <defaults>
</compile_context>

<pallas_src>
import math

import jax
import jax.numpy as jnp
import numpy as np
from jax.experimental import pallas as pl
from jax.experimental.pallas import tpu as pltpu

LN_EPS = 1e-5  # nn.LayerNorm default


def _patch_merging_kernel(x_ref, we_ref, wo_ref, bias_ref, o_ref):
    # x_ref:   (TH, 2, W2, 2C) — [:, 0] = even rows -> [x0 | x2], [:, 1] = odd -> [x1 | x3]
    # we_ref:  (2C, 2C) weight rows for the [x0 | x2] features (gamma pre-folded)
    # wo_ref:  (2C, 2C) weight rows for the [x1 | x3] features (gamma pre-folded)
    # bias_ref:(1, 2C) f32 == beta @ W^T
    # o_ref:   (TH*W2, 2C)
    rows = o_ref.shape[0]
    two_c = x_ref.shape[-1]
    four_c = 2 * two_c

    xt = x_ref[...]                                         # one contiguous tile load
    xe = xt[:, 0, :, :].reshape(rows, two_c).astype(jnp.float32)   # [x0 | x2]
    xo = xt[:, 1, :, :].reshape(rows, two_c).astype(jnp.float32)   # [x1 | x3]

    # LayerNorm statistics over the full 4C feature group, no concatenation.
    inv_4c = 1.0 / four_c
    mean = (jnp.sum(xe, axis=-1, keepdims=True)
            + jnp.sum(xo, axis=-1, keepdims=True)) * inv_4c
    ce = xe - mean
    co = xo - mean
    var = (jnp.sum(ce * ce, axis=-1, keepdims=True)
           + jnp.sum(co * co, axis=-1, keepdims=True)) * inv_4c
    inv = jax.lax.rsqrt(var + LN_EPS)

    # Split reduction matmul (gamma already folded into the weights); f32 accumulation.
    wdt = we_ref.dtype
    y = jnp.dot((ce * inv).astype(wdt), we_ref[...], preferred_element_type=jnp.float32)
    y = y + jnp.dot((co * inv).astype(wdt), wo_ref[...], preferred_element_type=jnp.float32)
    o_ref[...] = (y + bias_ref[...]).astype(o_ref.dtype)


def _vmem_capacity_bytes():
    try:
        info = pltpu.get_tpu_info()
        cap = getattr(info, "vmem_capacity_bytes", None)
        if cap:
            return int(cap)
    except Exception:
        pass
    return 64 << 20  # conservative default (v7x per-TensorCore VMEM)


def _per_th_bytes(w2, c, in_isz, out_isz):
    two_c = 2 * c
    return (2 * 2 * w2 * two_c * in_isz     # input tile (both halves), double-buffered
            + 2 * w2 * two_c * out_isz      # output tile, double-buffered
            + 8 * w2 * two_c * 4)           # f32 LN temporaries / matmul operands / acc


def _pick_row_tile(rows_total, w2, c, in_isz, out_isz, sub, target_rows, budget_bytes):
    """TH = row-pair groups per grid step; merged tokens per step = TH * w2."""
    per_th = _per_th_bytes(w2, c, in_isz, out_isz)
    th = min(max(1, budget_bytes // per_th),
             max(1, target_rows // max(w2, 1)),
             rows_total)
    if rows_total >= 2:
        th = min(th, rows_total // 2)        # keep >=2 grid steps (v7x dual-TC sharding)
    th = max(th, 1)
    if th >= rows_total:
        return rows_total
    # Output block rows (th * w2) must be a multiple of the sublane packing.
    step = max(1, sub // math.gcd(w2, sub))
    th = max(step, (th // step) * step)
    th = min(th, rows_total)
    if th >= rows_total:
        return rows_total
    # Prefer a tile that divides rows_total exactly (no partial last tile).
    for cand in range(th, step - 1, -step):
        if rows_total % cand == 0:
            return cand
    return th


def patch_merging_pallas(x, gamma, beta, weight, input_resolution, *, target_rows=None):
    """x: (B, H*W, C); gamma/beta: (4C,); weight: (2C, 4C) PyTorch Linear layout."""
    H, W = input_resolution
    B, L, C = x.shape
    assert L == H * W, "input feature has wrong size"
    assert H % 2 == 0 and W % 2 == 0, f"x size ({H}*{W}) are not even."
    assert weight.shape == (2 * C, 4 * C) and gamma.shape == (4 * C,) and beta.shape == (4 * C,)

    W2 = W // 2
    rows_total = B * (H // 2)          # number of 2-row groups
    M = rows_total * W2                # total merged tokens
    out_dtype = x.dtype

    # Free contiguous reinterpretation: xv[n, r, j, :] == x[b, 2*i + r, 2*j : 2*j + 2, :]
    # with n = b*(H/2) + i — i.e. [x0|x2] on r=0 and [x1|x3] on r=1. No HBM copy.
    xv = x.reshape(rows_total, 2, W2, 2 * C)

    # Fold the LN affine and the feature-group ordering into the weights (f32 fold).
    Wt = jnp.transpose(weight).astype(jnp.float32)          # (4C, 2C); y = v_norm @ Wt
    Wg = Wt * gamma.astype(jnp.float32)[:, None]            # gamma folded, still f32
    w_e = jnp.concatenate([Wg[0:C], Wg[2 * C:3 * C]], axis=0).astype(weight.dtype)  # [x0|x2]
    w_o = jnp.concatenate([Wg[C:2 * C], Wg[3 * C:4 * C]], axis=0).astype(weight.dtype)  # [x1|x3]
    bias = jnp.einsum("f,fo->o", beta.astype(jnp.float32), Wt,
                      precision=jax.lax.Precision.HIGHEST).reshape(1, 2 * C)

    in_isz = jnp.dtype(x.dtype).itemsize
    out_isz = jnp.dtype(out_dtype).itemsize
    w_isz = jnp.dtype(weight.dtype).itemsize
    sub = 8 * max(1, 4 // out_isz)                          # 8 f32 / 16 bf16 / 32 int8

    vmem_cap = _vmem_capacity_bytes()
    # Cap the scoped request at <=56 MiB: plenty for this mem-bound kernel, safe on
    # v7x's 64 MiB/TC, and comfortably above the default scoped limit on v5e/v6e.
    vmem_usable = min(max(int(vmem_cap * 0.85), 32 << 20), 56 << 20)
    if target_rows is None:
        target_rows = 4096 if vmem_cap >= (96 << 20) else 1024   # bigger tiles on 128 MiB parts

    w_resident = 2 * (2 * C) * (2 * C) * w_isz + (2 * C) * 4     # w_e + w_o + bias
    budget = max(vmem_usable - 2 * w_resident - (2 << 20), 1 << 20)
    TH = _pick_row_tile(rows_total, W2, C, in_isz, out_isz, sub, target_rows, budget)
    R = TH * W2
    num_tiles = pl.cdiv(rows_total, TH)

    est_bytes = TH * _per_th_bytes(W2, C, in_isz, out_isz) + 2 * w_resident + (2 << 20)
    vmem_limit_bytes = int(max(min(32 << 20, vmem_usable), min(est_bytes, vmem_usable)))

    cost = pl.CostEstimate(
        flops=2 * M * (4 * C) * (2 * C),
        transcendentals=M,                                   # one rsqrt per merged token
        bytes_accessed=(M * 4 * C * in_isz + M * 2 * C * out_isz
                        + 2 * (2 * C) * (2 * C) * w_isz + (2 * C) * 4),
    )

    def _make_call(single_buffer_resident):
        def resident(shape):
            if single_buffer_resident:
                return pl.BlockSpec(shape, lambda t: (0,) * len(shape),
                                    pipeline_mode=pl.Buffered(1))
            return pl.BlockSpec(shape, lambda t: (0,) * len(shape))

        return pl.pallas_call(
            _patch_merging_kernel,
            out_shape=jax.ShapeDtypeStruct((M, 2 * C), out_dtype),
            grid=(num_tiles,),
            in_specs=[
                # one dense, fully contiguous block covering both row halves
                pl.BlockSpec((TH, 2, W2, 2 * C), lambda t: (t, 0, 0, 0)),
                resident((2 * C, 2 * C)),
                resident((2 * C, 2 * C)),
                resident((1, 2 * C)),
            ],
            out_specs=pl.BlockSpec((R, 2 * C), lambda t: (t, 0)),
            compiler_params=pltpu.CompilerParams(
                dimension_semantics=("parallel",),           # shards the row grid on v7x
                vmem_limit_bytes=vmem_limit_bytes,
            ),
            cost_estimate=cost,
        )

    try:
        out = _make_call(True)(xv, w_e, w_o, bias)
    except Exception:
        # Fallback for jax builds without BlockSpec(pipeline_mode=...) support.
        out = _make_call(False)(xv, w_e, w_o, bias)

    return out.reshape(B, (H // 2) * W2, 2 * C)


if __name__ == "__main__":
    # Small shapes consistent with the module: dim=C=4, input_resolution=(16,16), B=2.
    B, H, W, C = 2, 16, 16, 4
    key = jax.random.PRNGKey(0)
    kx, kg, kb, kw = jax.random.split(key, 4)

    x = jax.random.normal(kx, (B, H * W, C), dtype=jnp.float32)
    gamma = 1.0 + 0.1 * jax.random.normal(kg, (4 * C,), dtype=jnp.float32)
    beta = 0.1 * jax.random.normal(kb, (4 * C,), dtype=jnp.float32)
    weight = 0.2 * jax.random.normal(kw, (2 * C, 4 * C), dtype=jnp.float32)

    y = patch_merging_pallas(x, gamma, beta, weight, (H, W))
    jax.block_until_ready(y)
    assert y.shape == (B, (H // 2) * (W // 2), 2 * C), y.shape

    # Pure-JAX reference mirroring the PyTorch forward.
    xg = x.reshape(B, H, W, C)
    x0 = xg[:, 0::2, 0::2, :]
    x1 = xg[:, 1::2, 0::2, :]
    x2 = xg[:, 0::2, 1::2, :]
    x3 = xg[:, 1::2, 1::2, :]
    xm = jnp.concatenate([x0, x1, x2, x3], axis=-1).reshape(B, -1, 4 * C)
    mu = jnp.mean(xm, axis=-1, keepdims=True)
    var = jnp.mean((xm - mu) ** 2, axis=-1, keepdims=True)
    xn = (xm - mu) * jax.lax.rsqrt(var + LN_EPS) * gamma + beta
    y_ref = jnp.einsum("bld,od->blo", xn, weight, precision=jax.lax.Precision.HIGHEST)

    np.testing.assert_allclose(np.asarray(y), np.asarray(y_ref), atol=2e-3, rtol=2e-3)
    print("KERNEL_OK")
</pallas_src>

<mosaic_0001>
module attributes {stable_mosaic.version = 11 : i64} {
  func.func @_patch_merging_kernel(%arg0: i32, %arg1: memref<8x2x8x8xf32, #tpu.memory_space<vmem>>, %arg2: memref<8x8xf32, #tpu.memory_space<vmem>>, %arg3: memref<8x8xf32, #tpu.memory_space<vmem>>, %arg4: memref<1x8xf32, #tpu.memory_space<vmem>>, %arg5: memref<64x8xf32, #tpu.memory_space<vmem>>) attributes {dimension_semantics = [#tpu.dimension_semantics<parallel>], iteration_bounds = array<i64: 2>, scalar_prefetch = 0 : i64, scratch_operands = 0 : i64, tpu.core_type = #tpu.core_type<tc>, window_params = [{transform_indices = @transform_0, window_bounds = array<i64: 8, 2, 8, 8>}, {pipeline_mode = #tpu.pipeline_mode<synchronous>, transform_indices = @transform_1, window_bounds = array<i64: 8, 8>}, {pipeline_mode = #tpu.pipeline_mode<synchronous>, transform_indices = @transform_2, window_bounds = array<i64: 8, 8>}, {pipeline_mode = #tpu.pipeline_mode<synchronous>, transform_indices = @transform_3, window_bounds = array<i64: 1, 8>}, {transform_indices = @transform_4, window_bounds = array<i64: 64, 8>}]} {
    %c0 = arith.constant 0 : index
    %c0_0 = arith.constant 0 : index
    %c0_1 = arith.constant 0 : index
    %c0_2 = arith.constant 0 : index
    %0 = vector.load %arg1[%c0, %c0_0, %c0_1, %c0_2] : memref<8x2x8x8xf32, #tpu.memory_space<vmem>>, vector<8x2x8x8xf32>
    %1 = vector.extract_strided_slice %0 {offsets = [0, 0, 0, 0], sizes = [8, 1, 8, 8], strides = [1, 1, 1, 1]} : vector<8x2x8x8xf32> to vector<8x1x8x8xf32>
    %2 = vector.shape_cast %1 : vector<8x1x8x8xf32> to vector<8x8x8xf32>
    %3 = vector.shape_cast %2 : vector<8x8x8xf32> to vector<64x8xf32>
    %4 = vector.extract_strided_slice %0 {offsets = [0, 1, 0, 0], sizes = [8, 1, 8, 8], strides = [1, 1, 1, 1]} : vector<8x2x8x8xf32> to vector<8x1x8x8xf32>
    %5 = vector.shape_cast %4 : vector<8x1x8x8xf32> to vector<8x8x8xf32>
    %6 = vector.shape_cast %5 : vector<8x8x8xf32> to vector<64x8xf32>
    %cst = arith.constant dense<0.000000e+00> : vector<64xf32>
    %7 = vector.multi_reduction <add>, %3, %cst [1] : vector<64x8xf32> to vector<64xf32>
    %8 = vector.shape_cast %7 : vector<64xf32> to vector<64x1xf32>
    %cst_3 = arith.constant dense<0.000000e+00> : vector<64xf32>
    %9 = vector.multi_reduction <add>, %6, %cst_3 [1] : vector<64x8xf32> to vector<64xf32>
    %10 = vector.shape_cast %9 : vector<64xf32> to vector<64x1xf32>
    %11 = arith.addf %8, %10 : vector<64x1xf32>
    %cst_4 = arith.constant 6.250000e-02 : f32
    %12 = vector.broadcast %cst_4 : f32 to vector<64x1xf32>
    %13 = arith.mulf %11, %12 : vector<64x1xf32>
    %14 = vector.broadcast %13 : vector<64x1xf32> to vector<64x8xf32>
    %15 = arith.subf %3, %14 : vector<64x8xf32>
    %16 = vector.broadcast %13 : vector<64x1xf32> to vector<64x8xf32>
    %17 = arith.subf %6, %16 : vector<64x8xf32>
    %18 = arith.mulf %15, %15 : vector<64x8xf32>
    %cst_5 = arith.constant dense<0.000000e+00> : vector<64xf32>
    %19 = vector.multi_reduction <add>, %18, %cst_5 [1] : vector<64x8xf32> to vector<64xf32>
    %20 = vector.shape_cast %19 : vector<64xf32> to vector<64x1xf32>
    %21 = arith.mulf %17, %17 : vector<64x8xf32>
    %cst_6 = arith.constant dense<0.000000e+00> : vector<64xf32>
    %22 = vector.multi_reduction <add>, %21, %cst_6 [1] : vector<64x8xf32> to vector<64xf32>
    %23 = vector.shape_cast %22 : vector<64xf32> to vector<64x1xf32>
    %24 = arith.addf %20, %23 : vector<64x1xf32>
    %cst_7 = arith.constant 6.250000e-02 : f32
    %25 = vector.broadcast %cst_7 : f32 to vector<64x1xf32>
    %26 = arith.mulf %24, %25 : vector<64x1xf32>
    %cst_8 = arith.constant 9.99999974E-6 : f32
    %27 = vector.broadcast %cst_8 : f32 to vector<64x1xf32>
    %28 = arith.addf %26, %27 : vector<64x1xf32>
    %29 = math.rsqrt %28 : vector<64x1xf32>
    %30 = vector.broadcast %29 : vector<64x1xf32> to vector<64x8xf32>
    %31 = arith.mulf %15, %30 : vector<64x8xf32>
    %c0_9 = arith.constant 0 : index
    %c0_10 = arith.constant 0 : index
    %32 = vector.load %arg2[%c0_9, %c0_10] : memref<8x8xf32, #tpu.memory_space<vmem>>, vector<8x8xf32>
    %cst_11 = arith.constant dense<0.000000e+00> : vector<64x8xf32>
    %33 = tpu.matmul %31, %32, %cst_11 {dimension_numbers = #tpu.dot_dimension_numbers<[1], [0], [0], [1], [0, 0, 1, 1], [], []>} : vector<64x8xf32>, vector<8x8xf32>, vector<64x8xf32> -> vector<64x8xf32>
    %34 = vector.broadcast %29 : vector<64x1xf32> to vector<64x8xf32>
    %35 = arith.mulf %17, %34 : vector<64x8xf32>
    %c0_12 = arith.constant 0 : index
    %c0_13 = arith.constant 0 : index
    %36 = vector.load %arg3[%c0_12, %c0_13] : memref<8x8xf32, #tpu.memory_space<vmem>>, vector<8x8xf32>
    %cst_14 = arith.constant dense<0.000000e+00> : vector<64x8xf32>
    %37 = tpu.matmul %35, %36, %cst_14 {dimension_numbers = #tpu.dot_dimension_numbers<[1], [0], [0], [1], [0, 0, 1, 1], [], []>} : vector<64x8xf32>, vector<8x8xf32>, vector<64x8xf32> -> vector<64x8xf32>
    %38 = arith.addf %33, %37 : vector<64x8xf32>
    %c0_15 = arith.constant 0 : index
    %c0_16 = arith.constant 0 : index
    %39 = vector.load %arg4[%c0_15, %c0_16] : memref<1x8xf32, #tpu.memory_space<vmem>>, vector<1x8xf32>
    %40 = vector.broadcast %39 : vector<1x8xf32> to vector<64x8xf32>
    %41 = arith.addf %38, %40 : vector<64x8xf32>
    %c0_17 = arith.constant 0 : index
    %c0_18 = arith.constant 0 : index
    %42 = vector.load %arg5[%c0_17, %c0_18] : memref<64x8xf32, #tpu.memory_space<vmem>>, vector<64x8xf32>
    tpu.vector_store %arg5[%c0_17, %c0_18], %41 {strides = array<i32>} : memref<64x8xf32, #tpu.memory_space<vmem>>, vector<64x8xf32>,
    return
  }
  func.func @transform_0(%arg0: i32) -> (i32, i32, i32, i32) {
    %c0_i32 = arith.constant 0 : i32
    %c0_i32_0 = arith.constant 0 : i32
    %c0_i32_1 = arith.constant 0 : i32
    %c0_i32_2 = arith.constant 0 : i32
    return %arg0, %c0_i32, %c0_i32_0, %c0_i32_1 : i32, i32, i32, i32
  }
  func.func @transform_1(%arg0: i32) -> (i32, i32) {
    %c0_i32 = arith.constant 0 : i32
    %c0_i32_0 = arith.constant 0 : i32
    %c0_i32_1 = arith.constant 0 : i32
    return %c0_i32, %c0_i32_0 : i32, i32
  }
  func.func @transform_2(%arg0: i32) -> (i32, i32) {
    %c0_i32 = arith.constant 0 : i32
    %c0_i32_0 = arith.constant 0 : i32
    %c0_i32_1 = arith.constant 0 : i32
    return %c0_i32, %c0_i32_0 : i32, i32
  }
  func.func @transform_3(%arg0: i32) -> (i32, i32) {
    %c0_i32 = arith.constant 0 : i32
    %c0_i32_0 = arith.constant 0 : i32
    %c0_i32_1 = arith.constant 0 : i32
    return %c0_i32, %c0_i32_0 : i32, i32
  }
  func.func @transform_4(%arg0: i32) -> (i32, i32) {
    %c0_i32 = arith.constant 0 : i32
    %c0_i32_0 = arith.constant 0 : i32
    return %arg0, %c0_i32 : i32, i32
  }
}

module attributes {stable_mosaic.version = 11 : i64} {
  func.func @_patch_merging_kernel(%arg0: i32, %arg1: memref<8x2x8x8xf32, #tpu.memory_space<vmem>>, %arg2: memref<8x8xf32, #tpu.memory_space<vmem>>, %arg3: memref<8x8xf32, #tpu.memory_space<vmem>>, %arg4: memref<1x8xf32, #tpu.memory_space<vmem>>, %arg5: memref<64x8xf32, #tpu.memory_space<vmem>>) attributes {dimension_semantics = [#tpu.dimension_semantics<parallel>], iteration_bounds = array<i64: 2>, scalar_prefetch = 0 : i64, scratch_operands = 0 : i64, tpu.core_type = #tpu.core_type<tc>, window_params = [{transform_indices = @transform_0, window_bounds = array<i64: 8, 2, 8, 8>}, {pipeline_mode = #tpu.pipeline_mode<synchronous>, transform_indices = @transform_1, window_bounds = array<i64: 8, 8>}, {pipeline_mode = #tpu.pipeline_mode<synchronous>, transform_indices = @transform_2, window_bounds = array<i64: 8, 8>}, {pipeline_mode = #tpu.pipeline_mode<synchronous>, transform_indices = @transform_3, window_bounds = array<i64: 1, 8>}, {transform_indices = @transform_4, window_bounds = array<i64: 64, 8>}]} {
    %c0 = arith.constant 0 : index
    %c0_0 = arith.constant 0 : index
    %c0_1 = arith.constant 0 : index
    %c0_2 = arith.constant 0 : index
    %0 = vector.load %arg1[%c0, %c0_0, %c0_1, %c0_2] : memref<8x2x8x8xf32, #tpu.memory_space<vmem>>, vector<8x2x8x8xf32>
    %1 = vector.extract_strided_slice %0 {offsets = [0, 0, 0, 0], sizes = [8, 1, 8, 8], strides = [1, 1, 1, 1]} : vector<8x2x8x8xf32> to vector<8x1x8x8xf32>
    %2 = vector.shape_cast %1 : vector<8x1x8x8xf32> to vector<8x8x8xf32>
    %3 = vector.shape_cast %2 : vector<8x8x8xf32> to vector<64x8xf32>
    %4 = vector.extract_strided_slice %0 {offsets = [0, 1, 0, 0], sizes = [8, 1, 8, 8], strides = [1, 1, 1, 1]} : vector<8x2x8x8xf32> to vector<8x1x8x8xf32>
    %5 = vector.shape_cast %4 : vector<8x1x8x8xf32> to vector<8x8x8xf32>
    %6 = vector.shape_cast %5 : vector<8x8x8xf32> to vector<64x8xf32>
    %cst = arith.constant dense<0.000000e+00> : vector<64xf32>
    %7 = vector.multi_reduction <add>, %3, %cst [1] : vector<64x8xf32> to vector<64xf32>
    %8 = vector.shape_cast %7 : vector<64xf32> to vector<64x1xf32>
    %cst_3 = arith.constant dense<0.000000e+00> : vector<64xf32>
    %9 = vector.multi_reduction <add>, %6, %cst_3 [1] : vector<64x8xf32> to vector<64xf32>
    %10 = vector.shape_cast %9 : vector<64xf32> to vector<64x1xf32>
    %11 = arith.addf %8, %10 : vector<64x1xf32>
    %cst_4 = arith.constant 6.250000e-02 : f32
    %12 = vector.broadcast %cst_4 : f32 to vector<64x1xf32>
    %13 = arith.mulf %11, %12 : vector<64x1xf32>
    %14 = vector.broadcast %13 : vector<64x1xf32> to vector<64x8xf32>
    %15 = arith.subf %3, %14 : vector<64x8xf32>
    %16 = vector.broadcast %13 : vector<64x1xf32> to vector<64x8xf32>
    %17 = arith.subf %6, %16 : vector<64x8xf32>
    %18 = arith.mulf %15, %15 : vector<64x8xf32>
    %cst_5 = arith.constant dense<0.000000e+00> : vector<64xf32>
    %19 = vector.multi_reduction <add>, %18, %cst_5 [1] : vector<64x8xf32> to vector<64xf32>
    %20 = vector.shape_cast %19 : vector<64xf32> to vector<64x1xf32>
    %21 = arith.mulf %17, %17 : vector<64x8xf32>
    %cst_6 = arith.constant dense<0.000000e+00> : vector<64xf32>
    %22 = vector.multi_reduction <add>, %21, %cst_6 [1] : vector<64x8xf32> to vector<64xf32>
    %23 = vector.shape_cast %22 : vector<64xf32> to vector<64x1xf32>
    %24 = arith.addf %20, %23 : vector<64x1xf32>
    %cst_7 = arith.constant 6.250000e-02 : f32
    %25 = vector.broadcast %cst_7 : f32 to vector<64x1xf32>
    %26 = arith.mulf %24, %25 : vector<64x1xf32>
    %cst_8 = arith.constant 9.99999974E-6 : f32
    %27 = vector.broadcast %cst_8 : f32 to vector<64x1xf32>
    %28 = arith.addf %26, %27 : vector<64x1xf32>
    %29 = math.rsqrt %28 : vector<64x1xf32>
    %30 = vector.broadcast %29 : vector<64x1xf32> to vector<64x8xf32>
    %31 = arith.mulf %15, %30 : vector<64x8xf32>
    %c0_9 = arith.constant 0 : index
    %c0_10 = arith.constant 0 : index
    %32 = vector.load %arg2[%c0_9, %c0_10] : memref<8x8xf32, #tpu.memory_space<vmem>>, vector<8x8xf32>
    %cst_11 = arith.constant dense<0.000000e+00> : vector<64x8xf32>
    %33 = tpu.matmul %31, %32, %cst_11 {dimension_numbers = #tpu.dot_dimension_numbers<[1], [0], [0], [1], [0, 0, 1, 1], [], []>} : vector<64x8xf32>, vector<8x8xf32>, vector<64x8xf32> -> vector<64x8xf32>
    %34 = vector.broadcast %29 : vector<64x1xf32> to vector<64x8xf32>
    %35 = arith.mulf %17, %34 : vector<64x8xf32>
    %c0_12 = arith.constant 0 : index
    %c0_13 = arith.constant 0 : index
    %36 = vector.load %arg3[%c0_12, %c0_13] : memref<8x8xf32, #tpu.memory_space<vmem>>, vector<8x8xf32>
    %cst_14 = arith.constant dense<0.000000e+00> : vector<64x8xf32>
    %37 = tpu.matmul %35, %36, %cst_14 {dimension_numbers = #tpu.dot_dimension_numbers<[1], [0], [0], [1], [0, 0, 1, 1], [], []>} : vector<64x8xf32>, vector<8x8xf32>, vector<64x8xf32> -> vector<64x8xf32>
    %38 = arith.addf %33, %37 : vector<64x8xf32>
    %c0_15 = arith.constant 0 : index
    %c0_16 = arith.constant 0 : index
    %39 = vector.load %arg4[%c0_15, %c0_16] : memref<1x8xf32, #tpu.memory_space<vmem>>, vector<1x8xf32>
    %40 = vector.broadcast %39 : vector<1x8xf32> to vector<64x8xf32>
    %41 = arith.addf %38, %40 : vector<64x8xf32>
    %c0_17 = arith.constant 0 : index
    %c0_18 = arith.constant 0 : index
    %42 = vector.load %arg5[%c0_17, %c0_18] : memref<64x8xf32, #tpu.memory_space<vmem>>, vector<64x8xf32>
    tpu.vector_store %arg5[%c0_17, %c0_18], %41 {strides = array<i32>} : memref<64x8xf32, #tpu.memory_space<vmem>>, vector<64x8xf32>,
    return
  }
  func.func @transform_0(%arg0: i32) -> (i32, i32, i32, i32) {
    %c0_i32 = arith.constant 0 : i32
    %c0_i32_0 = arith.constant 0 : i32
    %c0_i32_1 = arith.constant 0 : i32
    %c0_i32_2 = arith.constant 0 : i32
    return %arg0, %c0_i32, %c0_i32_0, %c0_i32_1 : i32, i32, i32, i32
  }
  func.func @transform_1(%arg0: i32) -> (i32, i32) {
    %c0_i32 = arith.constant 0 : i32
    %c0_i32_0 = arith.constant 0 : i32
    %c0_i32_1 = arith.constant 0 : i32
    return %c0_i32, %c0_i32_0 : i32, i32
  }
  func.func @transform_2(%arg0: i32) -> (i32, i32) {
    %c0_i32 = arith.constant 0 : i32
    %c0_i32_0 = arith.constant 0 : i32
    %c0_i32_1 = arith.constant 0 : i32
    return %c0_i32, %c0_i32_0 : i32, i32
  }
  func.func @transform_3(%arg0: i32) -> (i32, i32) {
    %c0_i32 = arith.constant 0 : i32
    %c0_i32_0 = arith.constant 0 : i32
    %c0_i32_1 = arith.constant 0 : i32
    return %c0_i32, %c0_i32_0 : i32, i32
  }
  func.func @transform_4(%arg0: i32) -> (i32, i32) {
    %c0_i32 = arith.constant 0 : i32
    %c0_i32_0 = arith.constant 0 : i32
    return %arg0, %c0_i32 : i32, i32
  }
}

</mosaic_0001>

<bundles_post_ra>
// kernel: tpu_custom_call.1
= control target key start
LH: loop header
LB: loop body
LE: loop exit
PB: predicated region body
PF: predicated region fallthrough
CT: control target
= control target key end

     0   :  { %s893_s15 = smov 0   ;;  %s1131_s0 = inlined_call_operand.vmem [shape: f32[16,2,8,8], index: 0, kind: input, shape index: {}]   ;;  %s1132_s1 = inlined_call_operand.vmem [shape: f32[8,8], index: 1, kind: input, shape index: {}]   ;;  %s1133_s2 = inlined_call_operand.vmem [shape: f32[8,8], index: 2, kind: input, shape index: {}]   ;;  %s1134_s3 = inlined_call_operand.vmem [shape: f32[1,8], index: 3, kind: input, shape index: {}]   ;;  %s1135_s4 = inlined_call_operand.vmem [shape: f32[128,8], index: 4, kind: output, shape index: {}]  }
   0x1 LB: > { %s752_s16 = sadd.s32 4294967295, %s866_s15   ;;  %p756_p0 = scmp.ge.s32.totalorder %s866_s15, 1  ;;  %s866_s15 = sphi %s893_s15, %s14_s15  }
   0x2   : > { %p164_p1 = scmp.lt.s32.totalorder %s866_s15, 3 }
   0x4   : > { %p165_p2 = pnand %p756_p0, %p164_p1 }
   0x5   : > { %s757_s17 = sshll.u32 (!%p165_p2), %s752_s16, 3  ;;  %vm220_vm0 = vcmask (!%p165_p2), 64512  }
   0x6   : > { %168 = sbr.rel (%p165_p2) target bundleno = 580 (0x244), region = 36  ;;  %p192_p3 = scmp.lt.s32.totalorder (!%p165_p2), %s757_s17, 15 }
   0xd   : > { %s1137_s17 = smov (!%p192_p3, %s757_s17), 15 }
   0xe   : > { %s781_s18 = sshll.u32 %s1137_s17, 4  ;;  %s761_s26 = sshll.u32 %s1137_s17, 3 }
   0xf   : > { %s907_s21 = scalar_lea.vmem %s1131_s0, %s781_s18  ;;  %s1110_s5 = scalar_lea.vmem %s1135_s4, %s761_s26 }
  0x10   : > { %v206_v0 = vld [vmem:[%s907_s21 + $0x10] sm:$0xff]  ;;  %v204_v1 = vld [vmem:[%s907_s21] sm:$0xff]  ;;  %v207_v2 = vld [vmem:[%s907_s21 + $0x18] sm:$0xff] }
  0x11   : > { %v224_v3 = vsel %vm220_vm0, %v206_v0, 0.0  ;;  %v221_v4 = vsel %vm220_vm0, %v204_v1, 0.0  ;;  %v205_v5 = vld [vmem:[%s907_s21 + $0x8] sm:$0xff]  ;;  %v248_v6 = vsel %vm220_vm0, %v207_v2, 0.0  ;;  %v208_v9 = vld [vmem:[%s907_s21 + $0x20] sm:$0xff]  ;;  %v925_v12 = vld [vmem:[%s907_s21 + $0x38] sm:$0xff] }
  0x12   : > { %225 = vadd.xlane.f32.xlu1 %v224_v3  ;;  %222 = vadd.xlane.f32.xlu0 %v221_v4  ;;  %v245_v7 = vsel %vm220_vm0, %v205_v5, 0.0  ;;  %v918_v8 = vld [vmem:[%s907_s21 + $0x28] sm:$0xff]  ;;  %v227_v11 = vsel %vm220_vm0, %v208_v9, 0.0  ;;  %v928_v13 = vld [vmem:[%s907_s21 + $0x30] sm:$0xff]  ;;  %v254_v14 = vsel %vm220_vm0, %v925_v12, 0.0  ;;  %v938_v17 = vld [vmem:[%s907_s21 + $0x40] sm:$0xff] }
  0x13   : > { %v251_v10 = vsel %vm220_vm0, %v918_v8, 0.0  ;;  %v230_v15 = vsel %vm220_vm0, %v928_v13, 0.0  ;;  %v935_v16 = vld [vmem:[%s907_s21 + $0x48] sm:$0xff]  ;;  %v233_v19 = vsel %vm220_vm0, %v938_v17, 0.0  ;;  %v945_v20 = vld [vmem:[%s907_s21 + $0x58] sm:$0xff]  ;;  %v948_v21 = vld [vmem:[%s907_s21 + $0x50] sm:$0xff] }
  0x14   : > { %v257_v18 = vsel %vm220_vm0, %v935_v16, 0.0  ;;  %v260_v22 = vsel %vm220_vm0, %v945_v20, 0.0  ;;  %v236_v23 = vsel %vm220_vm0, %v948_v21, 0.0  ;;  %v955_v24 = vld [vmem:[%s907_s21 + $0x68] sm:$0xff]  ;;  %v958_v25 = vld [vmem:[%s907_s21 + $0x60] sm:$0xff]  ;;  %v965_v28 = vld [vmem:[%s907_s21 + $0x78] sm:$0xff] }
  0x15   : > { %v263_v26 = vsel %vm220_vm0, %v955_v24, 0.0  ;;  %v239_v27 = vsel %vm220_vm0, %v958_v25, 0.0  ;;  %v968_v29 = vld [vmem:[%s907_s21 + $0x70] sm:$0xff]  ;;  %v266_v30 = vsel %vm220_vm0, %v965_v28, 0.0 }
  0x16   : > { %249 = vadd.xlane.f32.xlu1 %v248_v6  ;;  %246 = vadd.xlane.f32.xlu0 %v245_v7  ;;  %v242_v31 = vsel %vm220_vm0, %v968_v29, 0.0 }
  0x1a   : > { %252 = vadd.xlane.f32.xlu1 %v251_v10  ;;  %228 = vadd.xlane.f32.xlu0 %v227_v11 }
  0x1e   : > { %255 = vadd.xlane.f32.xlu1 %v254_v14  ;;  %231 = vadd.xlane.f32.xlu0 %v230_v15 }
  0x22   : > { %258 = vadd.xlane.f32.xlu1 %v257_v18  ;;  %234 = vadd.xlane.f32.xlu0 %v233_v19 }
  0x26   : > { %261 = vadd.xlane.f32.xlu1 %v260_v22  ;;  %237 = vadd.xlane.f32.xlu0 %v236_v23 }
  0x2a   : > { %264 = vadd.xlane.f32.xlu1 %v263_v26  ;;  %240 = vadd.xlane.f32.xlu0 %v239_v27 }
  0x2e   : > { %267 = vadd.xlane.f32.xlu1 %v266_v30  ;;  %243 = vadd.xlane.f32.xlu0 %v242_v31 }
  0x9f   : > { %v226_v32 = vpop.xlane.xlu1 %225  ;;  %v223_v33 = vpop.xlane.xlu0 %222 }
  0xa3   : > { %v250_v34 = vpop.xlane.xlu1 %249  ;;  %v247_v35 = vpop.xlane.xlu0 %246 }
  0xa4   : > { %v270_v36 = vadd.f32 %v250_v34, %v226_v32  ;;  %v269_v37 = vadd.f32 %v247_v35, %v223_v33 }
  0xa6   : > { %v278_v38 = vmul.f32 0.0625, %v270_v36  ;;  %v277_v39 = vmul.f32 0.0625, %v269_v37 }
  0xa7   : > { %v253_v40 = vpop.xlane.xlu1 %252  ;;  %v229_v41 = vpop.xlane.xlu0 %228 }
  0xa8   : > { %v974_v42 = vsub.f32 %v206_v0, %v278_v38  ;;  %v976_v43 = vsub.f32 %v207_v2, %v278_v38  ;;  %v978_v44 = vsub.f32 %v204_v1, %v277_v39  ;;  %v980_v45 = vsub.f32 %v205_v5, %v277_v39 }
  0xa9   : > { %v271_v46 = vadd.f32 %v253_v40, %v229_v41 }
  0xaa   : > { %v333_v47 = vmul.f32 %v980_v45, %v980_v45  ;;  %v301_v48 = vmul.f32 %v978_v44, %v978_v44  ;;  %v334_v52 = vmul.f32 %v976_v43, %v976_v43  ;;  %v302_v56 = vmul.f32 %v974_v42, %v974_v42 }
  0xab   : > { %v279_v49 = vmul.f32 0.0625, %v271_v46  ;;  %v256_v50 = vpop.xlane.xlu1 %255  ;;  %v232_v51 = vpop.xlane.xlu0 %231 }
  0xac   : > { %v341_v53 = vsel %vm220_vm0, %v333_v47, 0.0  ;;  %v309_v54 = vsel %vm220_vm0, %v301_v48, 0.0  ;;  %v272_v55 = vadd.f32 %v256_v50, %v232_v51  ;;  %v344_v60 = vsel %vm220_vm0, %v334_v52, 0.0 }
  0xad   : > { %v992_v57 = vsub.f32 %v208_v9, %v279_v49  ;;  %v995_v58 = vsub.f32 %v918_v8, %v279_v49  ;;  %342 = vadd.xlane.f32.xlu1 %v341_v53  ;;  %310 = vadd.xlane.f32.xlu0 %v309_v54  ;;  %v312_v3 = vsel %vm220_vm0, %v302_v56, 0.0  ;;  %v405_v53 = vld [vmem:[%s1132_s1] sm:$0xff] }
  0xae   : > { %v280_v59 = vmul.f32 0.0625, %v272_v55  ;;  %814 = vmatprep.subr.mxu0 %v405_v53 }
  0xaf   : > { %v259_v61 = vpop.xlane.xlu1 %258  ;;  %v235_v62 = vpop.xlane.xlu0 %234  ;;  %v335_v63 = vmul.f32 %v995_v58, %v995_v58  ;;  %v303_v0 = vmul.f32 %v992_v57, %v992_v57  ;;  %815 = vmatpush3.msra.mxu0 %v405_v53 }
  0xb0   : > { %v1003_v1 = vsub.f32 %v928_v13, %v280_v59  ;;  %v1006_v2 = vsub.f32 %v925_v12, %v280_v59  ;;  %v273_v4 = vadd.f32 %v259_v61, %v235_v62 }
  0xb1   : > { %345 = vadd.xlane.f32.xlu1 %v344_v60  ;;  %313 = vadd.xlane.f32.xlu0 %v312_v3  ;;  %v347_v5 = vsel %vm220_vm0, %v335_v63, 0.0  ;;  %v315_v7 = vsel %vm220_vm0, %v303_v0, 0.0 }
  0xb2   : > { %v281_v6 = vmul.f32 0.0625, %v273_v4  ;;  %v336_v8 = vmul.f32 %v1006_v2, %v1006_v2  ;;  %v304_v9 = vmul.f32 %v1003_v1, %v1003_v1 }
  0xb3   : > { %v262_v10 = vpop.xlane.xlu1 %261  ;;  %v238_v11 = vpop.xlane.xlu0 %237 }
  0xb4   : > { %v1016_v12 = vsub.f32 %v938_v17, %v281_v6  ;;  %v1019_v13 = vsub.f32 %v935_v16, %v281_v6  ;;  %v274_v14 = vadd.f32 %v262_v10, %v238_v11  ;;  %v350_v15 = vsel %vm220_vm0, %v336_v8, 0.0 }
  0xb5   : > { %348 = vadd.xlane.f32.xlu1 %v347_v5  ;;  %316 = vadd.xlane.f32.xlu0 %v315_v7  ;;  %v318_v19 = vsel %vm220_vm0, %v304_v9, 0.0 }
  0xb6   : > { %v282_v18 = vmul.f32 0.0625, %v274_v14  ;;  %v337_v22 = vmul.f32 %v1019_v13, %v1019_v13  ;;  %v305_v23 = vmul.f32 %v1016_v12, %v1016_v12 }
  0xb7   : > { %v265_v26 = vpop.xlane.xlu1 %264  ;;  %v241_v17 = vpop.xlane.xlu0 %240 }
  0xb8   : > { %v1028_v27 = vsub.f32 %v948_v21, %v282_v18  ;;  %v1031_v16 = vsub.f32 %v945_v20, %v282_v18  ;;  %v275_v30 = vadd.f32 %v265_v26, %v241_v17  ;;  %v353_v31 = vsel %vm220_vm0, %v337_v22, 0.0 }
  0xb9   : > { %351 = vadd.xlane.f32.xlu1 %v350_v15  ;;  %319 = vadd.xlane.f32.xlu0 %v318_v19  ;;  %v321_v33 = vsel %vm220_vm0, %v305_v23, 0.0 }
  0xba   : > { %v283_v32 = vmul.f32 0.0625, %v275_v30  ;;  %v338_v34 = vmul.f32 %v1031_v16, %v1031_v16  ;;  %v306_v35 = vmul.f32 %v1028_v27, %v1028_v27 }
  0xbb   : > { %v268_v36 = vpop.xlane.xlu1 %267  ;;  %v244_v21 = vpop.xlane.xlu0 %243 }
  0xbc   : > { %v1040_v37 = vsub.f32 %v958_v25, %v283_v32  ;;  %v1043_v20 = vsub.f32 %v955_v24, %v283_v32  ;;  %v276_v38 = vadd.f32 %v268_v36, %v244_v21  ;;  %v356_v39 = vsel %vm220_vm0, %v338_v34, 0.0 }
  0xbd   : > { %354 = vadd.xlane.f32.xlu1 %v353_v31  ;;  %322 = vadd.xlane.f32.xlu0 %v321_v33  ;;  %v324_v41 = vsel %vm220_vm0, %v306_v35, 0.0 }
  0xbe   : > { %v284_v40 = vmul.f32 0.0625, %v276_v38  ;;  %v339_v46 = vmul.f32 %v1043_v20, %v1043_v20  ;;  %v307_v47 = vmul.f32 %v1040_v37, %v1040_v37 }
  0xc0   : > { %v1052_v25 = vsub.f32 %v968_v29, %v284_v40  ;;  %v1055_v24 = vsub.f32 %v965_v28, %v284_v40  ;;  %v359_v48 = vsel %vm220_vm0, %v339_v46, 0.0  ;;  %v327_v49 = vsel %vm220_vm0, %v307_v47, 0.0  ;;  %v414_v28 = vld [vmem:[%s1133_s2] sm:$0xff] }
  0xc1   : > { %357 = vadd.xlane.f32.xlu1 %v356_v39  ;;  %325 = vadd.xlane.f32.xlu0 %v324_v41 }
  0xc2   : > { %v340_v50 = vmul.f32 %v1055_v24, %v1055_v24  ;;  %v308_v51 = vmul.f32 %v1052_v25, %v1052_v25  ;;  %800 = vmatprep.subr.mxu1 %v414_v28 }
  0xc3   : > { %801 = vmatpush3.msra.mxu1 %v414_v28 }
  0xc4   : > { %v362_v29 = vsel %vm220_vm0, %v340_v50, 0.0  ;;  %v330_v52 = vsel %vm220_vm0, %v308_v51, 0.0 }
  0xc5   : > { %360 = vadd.xlane.f32.xlu1 %v359_v48  ;;  %328 = vadd.xlane.f32.xlu0 %v327_v49 }
  0xc9   : > { %363 = vadd.xlane.f32.xlu1 %v362_v29  ;;  %331 = vadd.xlane.f32.xlu0 %v330_v52 }
 0x13a   : > { %v343_v54 = vpop.xlane.xlu1 %342  ;;  %v311_v55 = vpop.xlane.xlu0 %310 }
 0x13b   : > { %v365_v56 = vadd.f32 %v343_v54, %v311_v55 }
 0x13d   : > { %v373_v59 = vmul.f32 0.0625, %v365_v56 }
 0x13e   : > { %v346_v60 = vpop.xlane.xlu1 %345  ;;  %v314_v61 = vpop.xlane.xlu0 %313 }
 0x13f   : > { %v381_v62 = vadd.f32 1e-05, %v373_v59  ;;  %v366_v63 = vadd.f32 %v346_v60, %v314_v61 }
 0x141   : > { %844 = vrsqrt.f32 %v381_v62  ;;  %v374_v0 = vmul.f32 0.0625, %v366_v63 }
 0x142   : > { %v349_v3 = vpop.xlane.xlu1 %348  ;;  %v317_v4 = vpop.xlane.xlu0 %316 }
 0x143   : > { %v382_v5 = vadd.f32 1e-05, %v374_v0  ;;  %v367_v6 = vadd.f32 %v349_v3, %v317_v4 }
 0x145   : > { %846 = vrsqrt.f32 %v382_v5  ;;  %v375_v7 = vmul.f32 0.0625, %v367_v6 }
 0x146   : > { %v352_v8 = vpop.xlane.xlu1 %351  ;;  %v320_v9 = vpop.xlane.xlu0 %319 }
 0x147   : > { %v383_v10 = vadd.f32 1e-05, %v375_v7  ;;  %v368_v11 = vadd.f32 %v352_v8, %v320_v9 }
 0x149   : > { %848 = vrsqrt.f32 %v383_v10  ;;  %v376_v14 = vmul.f32 0.0625, %v368_v11 }
 0x14a   : > { %v355_v15 = vpop.xlane.xlu1 %354  ;;  %v323_v18 = vpop.xlane.xlu0 %322 }
 0x14b   : > { %v845_v19 = vpop.eup %844  ;;  %v384_v22 = vadd.f32 1e-05, %v376_v14  ;;  %v369_v23 = vadd.f32 %v355_v15, %v323_v18 }
 0x14c   : > { %v406_v26 = vmul.f32 %v845_v19, %v980_v45  ;;  %v397_v17 = vmul.f32 %v845_v19, %v978_v44 }
 0x14d   : > { %850 = vrsqrt.f32 %v384_v22  ;;  %v377_v30 = vmul.f32 0.0625, %v369_v23 }
 0x14e   : > { %v358_v31 = vpop.xlane.xlu1 %357  ;;  %802 = vmatprep.mubr.msk.f32.mxu1 %vm220_vm0, %v406_v26  ;;  %816 = vmatprep.mubr.msk.f32.mxu0 %vm220_vm0, %v397_v17  ;;  %v326_v32 = vpop.xlane.xlu0 %325 }
 0x14f   : > { %v847_v33 = vpop.eup %846  ;;  %v385_v34 = vadd.f32 1e-05, %v377_v30  ;;  %v370_v35 = vadd.f32 %v358_v31, %v326_v32 }
 0x150   : > { %v407_v36 = vmul.f32 %v847_v33, %v976_v43  ;;  %v398_v21 = vmul.f32 %v847_v33, %v974_v42 }
 0x151   : > { %852 = vrsqrt.f32 %v385_v34  ;;  %v378_v38 = vmul.f32 0.0625, %v370_v35 }
 0x152   : > { %v361_v45 = vpop.xlane.xlu1 %360  ;;  %803 = vmatmul.mubr.msk.f32.vlgmr.msra.gmra.mrb[0].mxu1 %vm220_vm0, %v407_v36  ;;  %817 = vmatmul.mubr.msk.f32.vlgmr.msra.gmra.mrb[0].mxu0 %vm220_vm0, %v398_v21  ;;  %v329_v44 = vpop.xlane.xlu0 %328 }
 0x153   : > { %v849_v39 = vpop.eup %848  ;;  %v386_v40 = vadd.f32 1e-05, %v378_v38  ;;  %v371_v41 = vadd.f32 %v361_v45, %v329_v44 }
 0x154   : > { %v408_v46 = vmul.f32 %v849_v39, %v995_v58  ;;  %v399_v47 = vmul.f32 %v849_v39, %v992_v57 }
 0x155   : > { %854 = vrsqrt.f32 %v386_v40  ;;  %v379_v48 = vmul.f32 0.0625, %v371_v41 }
 0x156   : > { %v364_v43 = vpop.xlane.xlu1 %363  ;;  %805 = vmatprep.mubr.msk.f32.mxu1 %vm220_vm0, %v408_v46  ;;  %819 = vmatprep.mubr.msk.f32.mxu0 %vm220_vm0, %v399_v47  ;;  %v332_v42 = vpop.xlane.xlu0 %331 }
 0x157   : > { %v851_v49 = vpop.eup %850  ;;  %v387_v50 = vadd.f32 1e-05, %v379_v48  ;;  %v372_v51 = vadd.f32 %v364_v43, %v332_v42 }
 0x158   : > { %v409_v29 = vmul.f32 %v851_v49, %v1006_v2  ;;  %v400_v52 = vmul.f32 %v851_v49, %v1003_v1 }
 0x159   : > { %856 = vrsqrt.f32 %v387_v50  ;;  %v380_v28 = vmul.f32 0.0625, %v372_v51 }
 0x15a   : > { %806 = vmatmul.mubr.msk.f32.gmra.mrb[2].mxu1 %vm220_vm0, %v409_v29  ;;  %820 = vmatmul.mubr.msk.f32.gmra.mrb[2].mxu0 %vm220_vm0, %v400_v52 }
 0x15b   : > { %v853_v57 = vpop.eup %852  ;;  %v388_v58 = vadd.f32 1e-05, %v380_v28 }
 0x15c   : > { %v410_v53 = vmul.f32 %v853_v57, %v1019_v13  ;;  %v401_v54 = vmul.f32 %v853_v57, %v1016_v12 }
 0x15d   : > { %858 = vrsqrt.f32 %v388_v58 }
 0x15e   : > { %808 = vmatprep.mubr.msk.f32.mxu1 %vm220_vm0, %v410_v53  ;;  %822 = vmatprep.mubr.msk.f32.mxu0 %vm220_vm0, %v401_v54 }
 0x15f   : > { %v855_v2 = vpop.eup %854 }
 0x160   : > { %v411_v1 = vmul.f32 %v855_v2, %v1031_v16  ;;  %v402_v55 = vmul.f32 %v855_v2, %v1028_v27 }
 0x162   : > { %809 = vmatmul.mubr.msk.f32.gmra.mrb[4].mxu1 %vm220_vm0, %v411_v1  ;;  %823 = vmatmul.mubr.msk.f32.gmra.mrb[4].mxu0 %vm220_vm0, %v402_v55 }
 0x163   : > { %v857_v56 = vpop.eup %856 }
 0x164   : > { %v412_v13 = vmul.f32 %v857_v56, %v1043_v20  ;;  %v403_v12 = vmul.f32 %v857_v56, %v1040_v37  ;;  %v778_v37 = vld [vmem:[%s1134_s3] ss:$0 sm:$0xff] }
 0x166   : > { %811 = vmatprep.mubr.msk.f32.mxu1 %vm220_vm0, %v412_v13  ;;  %825 = vmatprep.mubr.msk.f32.mxu0 %vm220_vm0, %v403_v12 }
 0x167   : > { %v859_v59 = vpop.eup %858 }
 0x168   : > { %v413_v60 = vmul.f32 %v859_v59, %v1055_v24  ;;  %v404_v16 = vmul.f32 %v859_v59, %v1052_v25 }
 0x16a   : > { %812 = vmatmul.mubr.msk.f32.gmra.mrb[6].mxu1 %vm220_vm0, %v413_v60  ;;  %826 = vmatmul.mubr.msk.f32.gmra.mrb[6].mxu0 %vm220_vm0, %v404_v16 }
 0x225   : > { %v804_v27 = vpop.f32.mrb[0].mxu1  ;;  %v818_v61 = vpop.f32.mrb[0].mxu0 }
 0x226   : > { %v640_v20 = vadd.f32 %v818_v61, %v804_v27  ;;  %v505_v62 = vpop.f32.mrb[1].mxu1  ;;  %v634_v63 = vpop.f32.mrb[1].mxu0 }
 0x227   : > { %v635_v25 = vadd.f32 %v634_v63, %v505_v62 }
 0x228   : > { %v681_v24 = vadd.f32 %v778_v37, %v640_v20 }
 0x229   : > { %v680_v0 = vadd.f32 %v778_v37, %v635_v25 }
 0x22a   : > { %689 = vst.msk [vmem:[%s1110_s5 + $0x8] sm:$0xff] %vm220_vm0, %v681_v24 }
 0x22b   : > { %688 = vst.msk [vmem:[%s1110_s5] sm:$0xff] %vm220_vm0, %v680_v0 }
 0x22d   : > { %v807_v3 = vpop.f32.mrb[2].mxu1  ;;  %v821_v4 = vpop.f32.mrb[2].mxu0 }
 0x22e   : > { %v650_v5 = vadd.f32 %v821_v4, %v807_v3  ;;  %v515_v6 = vpop.f32.mrb[3].mxu1  ;;  %v644_v7 = vpop.f32.mrb[3].mxu0 }
 0x22f   : > { %v645_v8 = vadd.f32 %v644_v7, %v515_v6 }
 0x230   : > { %v683_v9 = vadd.f32 %v778_v37, %v650_v5 }
 0x231   : > { %v682_v10 = vadd.f32 %v778_v37, %v645_v8 }
 0x232   : > { %691 = vst.msk [vmem:[%s1110_s5 + $0x18] sm:$0xff] %vm220_vm0, %v683_v9 }
 0x233   : > { %690 = vst.msk [vmem:[%s1110_s5 + $0x10] sm:$0xff] %vm220_vm0, %v682_v10 }
 0x235   : > { %v810_v11 = vpop.f32.mrb[4].mxu1  ;;  %v824_v14 = vpop.f32.mrb[4].mxu0 }
 0x236   : > { %v660_v15 = vadd.f32 %v824_v14, %v810_v11  ;;  %v525_v18 = vpop.f32.mrb[5].mxu1  ;;  %v654_v19 = vpop.f32.mrb[5].mxu0 }
 0x237   : > { %v655_v22 = vadd.f32 %v654_v19, %v525_v18 }
 0x238   : > { %v685_v23 = vadd.f32 %v778_v37, %v660_v15 }
 0x239   : > { %v684_v26 = vadd.f32 %v778_v37, %v655_v22 }
 0x23a   : > { %693 = vst.msk [vmem:[%s1110_s5 + $0x28] sm:$0xff] %vm220_vm0, %v685_v23 }
 0x23b   : > { %692 = vst.msk [vmem:[%s1110_s5 + $0x20] sm:$0xff] %vm220_vm0, %v684_v26 }
 0x23d   : > { %v813_v17 = vpop.f32.mrb[6].mxu1  ;;  %v827_v30 = vpop.f32.mrb[6].mxu0 }
 0x23e   : > { %v670_v31 = vadd.f32 %v827_v30, %v813_v17  ;;  %v535_v32 = vpop.f32.mrb[7].mxu1  ;;  %v664_v33 = vpop.f32.mrb[7].mxu0 }
 0x23f   : > { %v665_v34 = vadd.f32 %v664_v33, %v535_v32 }
 0x240   : > { %v687_v35 = vadd.f32 %v778_v37, %v670_v31 }
 0x241   : > { %v686_v36 = vadd.f32 %v778_v37, %v665_v34 }
 0x242   : > { %695 = vst.msk [vmem:[%s1110_s5 + $0x38] sm:$0xff] %vm220_vm0, %v687_v35 }
 0x243   : > { %694 = vst.msk [vmem:[%s1110_s5 + $0x30] sm:$0xff] %vm220_vm0, %v686_v36 }
 0x244 PF: > { %s14_s15 = sadd.s32 1, %s866_s15  }
 0x245   : > { %p11_p4 = scmp.ge.s32.totalorder %s14_s15, 4  }
 0x247   :  { %13 = sbr.rel (!%p11_p4) target bundleno = 1 (0x1), region = 66 }

// kernel: tpu_custom_call.1
= control target key start
LH: loop header
LB: loop body
LE: loop exit
PB: predicated region body
PF: predicated region fallthrough
CT: control target
= control target key end

     0   :  { %s893_s15 = smov 0   ;;  %s1131_s0 = inlined_call_operand.vmem [shape: f32[16,2,8,8], index: 0, kind: input, shape index: {}]   ;;  %s1132_s1 = inlined_call_operand.vmem [shape: f32[8,8], index: 1, kind: input, shape index: {}]   ;;  %s1133_s2 = inlined_call_operand.vmem [shape: f32[8,8], index: 2, kind: input, shape index: {}]   ;;  %s1134_s3 = inlined_call_operand.vmem [shape: f32[1,8], index: 3, kind: input, shape index: {}]   ;;  %s1135_s4 = inlined_call_operand.vmem [shape: f32[128,8], index: 4, kind: output, shape index: {}]  }
   0x1 LB: > { %s752_s16 = sadd.s32 4294967295, %s866_s15   ;;  %p756_p0 = scmp.ge.s32.totalorder %s866_s15, 1  ;;  %s866_s15 = sphi %s893_s15, %s14_s15  }
   0x2   : > { %p164_p1 = scmp.lt.s32.totalorder %s866_s15, 3 }
   0x4   : > { %p165_p2 = pnand %p756_p0, %p164_p1 }
   0x5   : > { %s757_s17 = sshll.u32 (!%p165_p2), %s752_s16, 3  ;;  %vm220_vm0 = vcmask (!%p165_p2), 64512  }
   0x6   : > { %168 = sbr.rel (%p165_p2) target bundleno = 580 (0x244), region = 36  ;;  %p192_p3 = scmp.lt.s32.totalorder (!%p165_p2), %s757_s17, 15 }
   0xd   : > { %s1137_s17 = smov (!%p192_p3, %s757_s17), 15 }
   0xe   : > { %s781_s18 = sshll.u32 %s1137_s17, 4  ;;  %s761_s26 = sshll.u32 %s1137_s17, 3 }
   0xf   : > { %s907_s21 = scalar_lea.vmem %s1131_s0, %s781_s18  ;;  %s1110_s5 = scalar_lea.vmem %s1135_s4, %s761_s26 }
  0x10   : > { %v206_v0 = vld [vmem:[%s907_s21 + $0x10] sm:$0xff]  ;;  %v204_v1 = vld [vmem:[%s907_s21] sm:$0xff]  ;;  %v207_v2 = vld [vmem:[%s907_s21 + $0x18] sm:$0xff] }
  0x11   : > { %v224_v3 = vsel %vm220_vm0, %v206_v0, 0.0  ;;  %v221_v4 = vsel %vm220_vm0, %v204_v1, 0.0  ;;  %v205_v5 = vld [vmem:[%s907_s21 + $0x8] sm:$0xff]  ;;  %v248_v6 = vsel %vm220_vm0, %v207_v2, 0.0  ;;  %v208_v9 = vld [vmem:[%s907_s21 + $0x20] sm:$0xff]  ;;  %v925_v12 = vld [vmem:[%s907_s21 + $0x38] sm:$0xff] }
  0x12   : > { %225 = vadd.xlane.f32.xlu1 %v224_v3  ;;  %222 = vadd.xlane.f32.xlu0 %v221_v4  ;;  %v245_v7 = vsel %vm220_vm0, %v205_v5, 0.0  ;;  %v918_v8 = vld [vmem:[%s907_s21 + $0x28] sm:$0xff]  ;;  %v227_v11 = vsel %vm220_vm0, %v208_v9, 0.0  ;;  %v928_v13 = vld [vmem:[%s907_s21 + $0x30] sm:$0xff]  ;;  %v254_v14 = vsel %vm220_vm0, %v925_v12, 0.0  ;;  %v938_v17 = vld [vmem:[%s907_s21 + $0x40] sm:$0xff] }
  0x13   : > { %v251_v10 = vsel %vm220_vm0, %v918_v8, 0.0  ;;  %v230_v15 = vsel %vm220_vm0, %v928_v13, 0.0  ;;  %v935_v16 = vld [vmem:[%s907_s21 + $0x48] sm:$0xff]  ;;  %v233_v19 = vsel %vm220_vm0, %v938_v17, 0.0  ;;  %v945_v20 = vld [vmem:[%s907_s21 + $0x58] sm:$0xff]  ;;  %v948_v21 = vld [vmem:[%s907_s21 + $0x50] sm:$0xff] }
  0x14   : > { %v257_v18 = vsel %vm220_vm0, %v935_v16, 0.0  ;;  %v260_v22 = vsel %vm220_vm0, %v945_v20, 0.0  ;;  %v236_v23 = vsel %vm220_vm0, %v948_v21, 0.0  ;;  %v955_v24 = vld [vmem:[%s907_s21 + $0x68] sm:$0xff]  ;;  %v958_v25 = vld [vmem:[%s907_s21 + $0x60] sm:$0xff]  ;;  %v965_v28 = vld [vmem:[%s907_s21 + $0x78] sm:$0xff] }
  0x15   : > { %v263_v26 = vsel %vm220_vm0, %v955_v24, 0.0  ;;  %v239_v27 = vsel %vm220_vm0, %v958_v25, 0.0  ;;  %v968_v29 = vld [vmem:[%s907_s21 + $0x70] sm:$0xff]  ;;  %v266_v30 = vsel %vm220_vm0, %v965_v28, 0.0 }
  0x16   : > { %249 = vadd.xlane.f32.xlu1 %v248_v6  ;;  %246 = vadd.xlane.f32.xlu0 %v245_v7  ;;  %v242_v31 = vsel %vm220_vm0, %v968_v29, 0.0 }
  0x1a   : > { %252 = vadd.xlane.f32.xlu1 %v251_v10  ;;  %228 = vadd.xlane.f32.xlu0 %v227_v11 }
  0x1e   : > { %255 = vadd.xlane.f32.xlu1 %v254_v14  ;;  %231 = vadd.xlane.f32.xlu0 %v230_v15 }
  0x22   : > { %258 = vadd.xlane.f32.xlu1 %v257_v18  ;;  %234 = vadd.xlane.f32.xlu0 %v233_v19 }
  0x26   : > { %261 = vadd.xlane.f32.xlu1 %v260_v22  ;;  %237 = vadd.xlane.f32.xlu0 %v236_v23 }
  0x2a   : > { %264 = vadd.xlane.f32.xlu1 %v263_v26  ;;  %240 = vadd.xlane.f32.xlu0 %v239_v27 }
  0x2e   : > { %267 = vadd.xlane.f32.xlu1 %v266_v30  ;;  %243 = vadd.xlane.f32.xlu0 %v242_v31 }
  0x9f   : > { %v226_v32 = vpop.xlane.xlu1 %225  ;;  %v223_v33 = vpop.xlane.xlu0 %222 }
  0xa3   : > { %v250_v34 = vpop.xlane.xlu1 %249  ;;  %v247_v35 = vpop.xlane.xlu0 %246 }
  0xa4   : > { %v270_v36 = vadd.f32 %v250_v34, %v226_v32  ;;  %v269_v37 = vadd.f32 %v247_v35, %v223_v33 }
  0xa6   : > { %v278_v38 = vmul.f32 0.0625, %v270_v36  ;;  %v277_v39 = vmul.f32 0.0625, %v269_v37 }
  0xa7   : > { %v253_v40 = vpop.xlane.xlu1 %252  ;;  %v229_v41 = vpop.xlane.xlu0 %228 }
  0xa8   : > { %v974_v42 = vsub.f32 %v206_v0, %v278_v38  ;;  %v976_v43 = vsub.f32 %v207_v2, %v278_v38  ;;  %v978_v44 = vsub.f32 %v204_v1, %v277_v39  ;;  %v980_v45 = vsub.f32 %v205_v5, %v277_v39 }
  0xa9   : > { %v271_v46 = vadd.f32 %v253_v40, %v229_v41 }
  0xaa   : > { %v333_v47 = vmul.f32 %v980_v45, %v980_v45  ;;  %v301_v48 = vmul.f32 %v978_v44, %v978_v44  ;;  %v334_v52 = vmul.f32 %v976_v43, %v976_v43  ;;  %v302_v56 = vmul.f32 %v974_v42, %v974_v42 }
  0xab   : > { %v279_v49 = vmul.f32 0.0625, %v271_v46  ;;  %v256_v50 = vpop.xlane.xlu1 %255  ;;  %v232_v51 = vpop.xlane.xlu0 %231 }
  0xac   : > { %v341_v53 = vsel %vm220_vm0, %v333_v47, 0.0  ;;  %v309_v54 = vsel %vm220_vm0, %v301_v48, 0.0  ;;  %v272_v55 = vadd.f32 %v256_v50, %v232_v51  ;;  %v344_v60 = vsel %vm220_vm0, %v334_v52, 0.0 }
  0xad   : > { %v992_v57 = vsub.f32 %v208_v9, %v279_v49  ;;  %v995_v58 = vsub.f32 %v918_v8, %v279_v49  ;;  %342 = vadd.xlane.f32.xlu1 %v341_v53  ;;  %310 = vadd.xlane.f32.xlu0 %v309_v54  ;;  %v312_v3 = vsel %vm220_vm0, %v302_v56, 0.0  ;;  %v405_v53 = vld [vmem:[%s1132_s1] sm:$0xff] }
  0xae   : > { %v280_v59 = vmul.f32 0.0625, %v272_v55  ;;  %814 = vmatprep.subr.mxu0 %v405_v53 }
  0xaf   : > { %v259_v61 = vpop.xlane.xlu1 %258  ;;  %v235_v62 = vpop.xlane.xlu0 %234  ;;  %v335_v63 = vmul.f32 %v995_v58, %v995_v58  ;;  %v303_v0 = vmul.f32 %v992_v57, %v992_v57  ;;  %815 = vmatpush3.msra.mxu0 %v405_v53 }
  0xb0   : > { %v1003_v1 = vsub.f32 %v928_v13, %v280_v59  ;;  %v1006_v2 = vsub.f32 %v925_v12, %v280_v59  ;;  %v273_v4 = vadd.f32 %v259_v61, %v235_v62 }
  0xb1   : > { %345 = vadd.xlane.f32.xlu1 %v344_v60  ;;  %313 = vadd.xlane.f32.xlu0 %v312_v3  ;;  %v347_v5 = vsel %vm220_vm0, %v335_v63, 0.0  ;;  %v315_v7 = vsel %vm220_vm0, %v303_v0, 0.0 }
  0xb2   : > { %v281_v6 = vmul.f32 0.0625, %v273_v4  ;;  %v336_v8 = vmul.f32 %v1006_v2, %v1006_v2  ;;  %v304_v9 = vmul.f32 %v1003_v1, %v1003_v1 }
  0xb3   : > { %v262_v10 = vpop.xlane.xlu1 %261  ;;  %v238_v11 = vpop.xlane.xlu0 %237 }
  0xb4   : > { %v1016_v12 = vsub.f32 %v938_v17, %v281_v6  ;;  %v1019_v13 = vsub.f32 %v935_v16, %v281_v6  ;;  %v274_v14 = vadd.f32 %v262_v10, %v238_v11  ;;  %v350_v15 = vsel %vm220_vm0, %v336_v8, 0.0 }
  0xb5   : > { %348 = vadd.xlane.f32.xlu1 %v347_v5  ;;  %316 = vadd.xlane.f32.xlu0 %v315_v7  ;;  %v318_v19 = vsel %vm220_vm0, %v304_v9, 0.0 }
  0xb6   : > { %v282_v18 = vmul.f32 0.0625, %v274_v14  ;;  %v337_v22 = vmul.f32 %v1019_v13, %v1019_v13  ;;  %v305_v23 = vmul.f32 %v1016_v12, %v1016_v12 }
  0xb7   : > { %v265_v26 = vpop.xlane.xlu1 %264  ;;  %v241_v17 = vpop.xlane.xlu0 %240 }
  0xb8   : > { %v1028_v27 = vsub.f32 %v948_v21, %v282_v18  ;;  %v1031_v16 = vsub.f32 %v945_v20, %v282_v18  ;;  %v275_v30 = vadd.f32 %v265_v26, %v241_v17  ;;  %v353_v31 = vsel %vm220_vm0, %v337_v22, 0.0 }
  0xb9   : > { %351 = vadd.xlane.f32.xlu1 %v350_v15  ;;  %319 = vadd.xlane.f32.xlu0 %v318_v19  ;;  %v321_v33 = vsel %vm220_vm0, %v305_v23, 0.0 }
  0xba   : > { %v283_v32 = vmul.f32 0.0625, %v275_v30  ;;  %v338_v34 = vmul.f32 %v1031_v16, %v1031_v16  ;;  %v306_v35 = vmul.f32 %v1028_v27, %v1028_v27 }
  0xbb   : > { %v268_v36 = vpop.xlane.xlu1 %267  ;;  %v244_v21 = vpop.xlane.xlu0 %243 }
  0xbc   : > { %v1040_v37 = vsub.f32 %v958_v25, %v283_v32  ;;  %v1043_v20 = vsub.f32 %v955_v24, %v283_v32  ;;  %v276_v38 = vadd.f32 %v268_v36, %v244_v21  ;;  %v356_v39 = vsel %vm220_vm0, %v338_v34, 0.0 }
  0xbd   : > { %354 = vadd.xlane.f32.xlu1 %v353_v31  ;;  %322 = vadd.xlane.f32.xlu0 %v321_v33  ;;  %v324_v41 = vsel %vm220_vm0, %v306_v35, 0.0 }
  0xbe   : > { %v284_v40 = vmul.f32 0.0625, %v276_v38  ;;  %v339_v46 = vmul.f32 %v1043_v20, %v1043_v20  ;;  %v307_v47 = vmul.f32 %v1040_v37, %v1040_v37 }
  0xc0   : > { %v1052_v25 = vsub.f32 %v968_v29, %v284_v40  ;;  %v1055_v24 = vsub.f32 %v965_v28, %v284_v40  ;;  %v359_v48 = vsel %vm220_vm0, %v339_v46, 0.0  ;;  %v327_v49 = vsel %vm220_vm0, %v307_v47, 0.0  ;;  %v414_v28 = vld [vmem:[%s1133_s2] sm:$0xff] }
  0xc1   : > { %357 = vadd.xlane.f32.xlu1 %v356_v39  ;;  %325 = vadd.xlane.f32.xlu0 %v324_v41 }
  0xc2   : > { %v340_v50 = vmul.f32 %v1055_v24, %v1055_v24  ;;  %v308_v51 = vmul.f32 %v1052_v25, %v1052_v25  ;;  %800 = vmatprep.subr.mxu1 %v414_v28 }
  0xc3   : > { %801 = vmatpush3.msra.mxu1 %v414_v28 }
  0xc4   : > { %v362_v29 = vsel %vm220_vm0, %v340_v50, 0.0  ;;  %v330_v52 = vsel %vm220_vm0, %v308_v51, 0.0 }
  0xc5   : > { %360 = vadd.xlane.f32.xlu1 %v359_v48  ;;  %328 = vadd.xlane.f32.xlu0 %v327_v49 }
  0xc9   : > { %363 = vadd.xlane.f32.xlu1 %v362_v29  ;;  %331 = vadd.xlane.f32.xlu0 %v330_v52 }
 0x13a   : > { %v343_v54 = vpop.xlane.xlu1 %342  ;;  %v311_v55 = vpop.xlane.xlu0 %310 }
 0x13b   : > { %v365_v56 = vadd.f32 %v343_v54, %v311_v55 }
 0x13d   : > { %v373_v59 = vmul.f32 0.0625, %v365_v56 }
 0x13e   : > { %v346_v60 = vpop.xlane.xlu1 %345  ;;  %v314_v61 = vpop.xlane.xlu0 %313 }
 0x13f   : > { %v381_v62 = vadd.f32 1e-05, %v373_v59  ;;  %v366_v63 = vadd.f32 %v346_v60, %v314_v61 }
 0x141   : > { %844 = vrsqrt.f32 %v381_v62  ;;  %v374_v0 = vmul.f32 0.0625, %v366_v63 }
 0x142   : > { %v349_v3 = vpop.xlane.xlu1 %348  ;;  %v317_v4 = vpop.xlane.xlu0 %316 }
 0x143   : > { %v382_v5 = vadd.f32 1e-05, %v374_v0  ;;  %v367_v6 = vadd.f32 %v349_v3, %v317_v4 }
 0x145   : > { %846 = vrsqrt.f32 %v382_v5  ;;  %v375_v7 = vmul.f32 0.0625, %v367_v6 }
 0x146   : > { %v352_v8 = vpop.xlane.xlu1 %351  ;;  %v320_v9 = vpop.xlane.xlu0 %319 }
 0x147   : > { %v383_v10 = vadd.f32 1e-05, %v375_v7  ;;  %v368_v11 = vadd.f32 %v352_v8, %v320_v9 }
 0x149   : > { %848 = vrsqrt.f32 %v383_v10  ;;  %v376_v14 = vmul.f32 0.0625, %v368_v11 }
 0x14a   : > { %v355_v15 = vpop.xlane.xlu1 %354  ;;  %v323_v18 = vpop.xlane.xlu0 %322 }
 0x14b   : > { %v845_v19 = vpop.eup %844  ;;  %v384_v22 = vadd.f32 1e-05, %v376_v14  ;;  %v369_v23 = vadd.f32 %v355_v15, %v323_v18 }
 0x14c   : > { %v406_v26 = vmul.f32 %v845_v19, %v980_v45  ;;  %v397_v17 = vmul.f32 %v845_v19, %v978_v44 }
 0x14d   : > { %850 = vrsqrt.f32 %v384_v22  ;;  %v377_v30 = vmul.f32 0.0625, %v369_v23 }
 0x14e   : > { %v358_v31 = vpop.xlane.xlu1 %357  ;;  %802 = vmatprep.mubr.msk.f32.mxu1 %vm220_vm0, %v406_v26  ;;  %816 = vmatprep.mubr.msk.f32.mxu0 %vm220_vm0, %v397_v17  ;;  %v326_v32 = vpop.xlane.xlu0 %325 }
 0x14f   : > { %v847_v33 = vpop.eup %846  ;;  %v385_v34 = vadd.f32 1e-05, %v377_v30  ;;  %v370_v35 = vadd.f32 %v358_v31, %v326_v32 }
 0x150   : > { %v407_v36 = vmul.f32 %v847_v33, %v976_v43  ;;  %v398_v21 = vmul.f32 %v847_v33, %v974_v42 }
 0x151   : > { %852 = vrsqrt.f32 %v385_v34  ;;  %v378_v38 = vmul.f32 0.0625, %v370_v35 }
 0x152   : > { %v361_v45 = vpop.xlane.xlu1 %360  ;;  %803 = vmatmul.mubr.msk.f32.vlgmr.msra.gmra.mrb[0].mxu1 %vm220_vm0, %v407_v36  ;;  %817 = vmatmul.mubr.msk.f32.vlgmr.msra.gmra.mrb[0].mxu0 %vm220_vm0, %v398_v21  ;;  %v329_v44 = vpop.xlane.xlu0 %328 }
 0x153   : > { %v849_v39 = vpop.eup %848  ;;  %v386_v40 = vadd.f32 1e-05, %v378_v38  ;;  %v371_v41 = vadd.f32 %v361_v45, %v329_v44 }
 0x154   : > { %v408_v46 = vmul.f32 %v849_v39, %v995_v58  ;;  %v399_v47 = vmul.f32 %v849_v39, %v992_v57 }
 0x155   : > { %854 = vrsqrt.f32 %v386_v40  ;;  %v379_v48 = vmul.f32 0.0625, %v371_v41 }
 0x156   : > { %v364_v43 = vpop.xlane.xlu1 %363  ;;  %805 = vmatprep.mubr.msk.f32.mxu1 %vm220_vm0, %v408_v46  ;;  %819 = vmatprep.mubr.msk.f32.mxu0 %vm220_vm0, %v399_v47  ;;  %v332_v42 = vpop.xlane.xlu0 %331 }
 0x157   : > { %v851_v49 = vpop.eup %850  ;;  %v387_v50 = vadd.f32 1e-05, %v379_v48  ;;  %v372_v51 = vadd.f32 %v364_v43, %v332_v42 }
 0x158   : > { %v409_v29 = vmul.f32 %v851_v49, %v1006_v2  ;;  %v400_v52 = vmul.f32 %v851_v49, %v1003_v1 }
 0x159   : > { %856 = vrsqrt.f32 %v387_v50  ;;  %v380_v28 = vmul.f32 0.0625, %v372_v51 }
 0x15a   : > { %806 = vmatmul.mubr.msk.f32.gmra.mrb[2].mxu1 %vm220_vm0, %v409_v29  ;;  %820 = vmatmul.mubr.msk.f32.gmra.mrb[2].mxu0 %vm220_vm0, %v400_v52 }
 0x15b   : > { %v853_v57 = vpop.eup %852  ;;  %v388_v58 = vadd.f32 1e-05, %v380_v28 }
 0x15c   : > { %v410_v53 = vmul.f32 %v853_v57, %v1019_v13  ;;  %v401_v54 = vmul.f32 %v853_v57, %v1016_v12 }
 0x15d   : > { %858 = vrsqrt.f32 %v388_v58 }
 0x15e   : > { %808 = vmatprep.mubr.msk.f32.mxu1 %vm220_vm0, %v410_v53  ;;  %822 = vmatprep.mubr.msk.f32.mxu0 %vm220_vm0, %v401_v54 }
 0x15f   : > { %v855_v2 = vpop.eup %854 }
 0x160   : > { %v411_v1 = vmul.f32 %v855_v2, %v1031_v16  ;;  %v402_v55 = vmul.f32 %v855_v2, %v1028_v27 }
 0x162   : > { %809 = vmatmul.mubr.msk.f32.gmra.mrb[4].mxu1 %vm220_vm0, %v411_v1  ;;  %823 = vmatmul.mubr.msk.f32.gmra.mrb[4].mxu0 %vm220_vm0, %v402_v55 }
 0x163   : > { %v857_v56 = vpop.eup %856 }
 0x164   : > { %v412_v13 = vmul.f32 %v857_v56, %v1043_v20  ;;  %v403_v12 = vmul.f32 %v857_v56, %v1040_v37  ;;  %v778_v37 = vld [vmem:[%s1134_s3] ss:$0 sm:$0xff] }
 0x166   : > { %811 = vmatprep.mubr.msk.f32.mxu1 %vm220_vm0, %v412_v13  ;;  %825 = vmatprep.mubr.msk.f32.mxu0 %vm220_vm0, %v403_v12 }
 0x167   : > { %v859_v59 = vpop.eup %858 }
 0x168   : > { %v413_v60 = vmul.f32 %v859_v59, %v1055_v24  ;;  %v404_v16 = vmul.f32 %v859_v59, %v1052_v25 }
 0x16a   : > { %812 = vmatmul.mubr.msk.f32.gmra.mrb[6].mxu1 %vm220_vm0, %v413_v60  ;;  %826 = vmatmul.mubr.msk.f32.gmra.mrb[6].mxu0 %vm220_vm0, %v404_v16 }
 0x225   : > { %v804_v27 = vpop.f32.mrb[0].mxu1  ;;  %v818_v61 = vpop.f32.mrb[0].mxu0 }
 0x226   : > { %v640_v20 = vadd.f32 %v818_v61, %v804_v27  ;;  %v505_v62 = vpop.f32.mrb[1].mxu1  ;;  %v634_v63 = vpop.f32.mrb[1].mxu0 }
 0x227   : > { %v635_v25 = vadd.f32 %v634_v63, %v505_v62 }
 0x228   : > { %v681_v24 = vadd.f32 %v778_v37, %v640_v20 }
 0x229   : > { %v680_v0 = vadd.f32 %v778_v37, %v635_v25 }
 0x22a   : > { %689 = vst.msk [vmem:[%s1110_s5 + $0x8] sm:$0xff] %vm220_vm0, %v681_v24 }
 0x22b   : > { %688 = vst.msk [vmem:[%s1110_s5] sm:$0xff] %vm220_vm0, %v680_v0 }
 0x22d   : > { %v807_v3 = vpop.f32.mrb[2].mxu1  ;;  %v821_v4 = vpop.f32.mrb[2].mxu0 }
 0x22e   : > { %v650_v5 = vadd.f32 %v821_v4, %v807_v3  ;;  %v515_v6 = vpop.f32.mrb[3].mxu1  ;;  %v644_v7 = vpop.f32.mrb[3].mxu0 }
 0x22f   : > { %v645_v8 = vadd.f32 %v644_v7, %v515_v6 }
 0x230   : > { %v683_v9 = vadd.f32 %v778_v37, %v650_v5 }
 0x231   : > { %v682_v10 = vadd.f32 %v778_v37, %v645_v8 }
 0x232   : > { %691 = vst.msk [vmem:[%s1110_s5 + $0x18] sm:$0xff] %vm220_vm0, %v683_v9 }
 0x233   : > { %690 = vst.msk [vmem:[%s1110_s5 + $0x10] sm:$0xff] %vm220_vm0, %v682_v10 }
 0x235   : > { %v810_v11 = vpop.f32.mrb[4].mxu1  ;;  %v824_v14 = vpop.f32.mrb[4].mxu0 }
 0x236   : > { %v660_v15 = vadd.f32 %v824_v14, %v810_v11  ;;  %v525_v18 = vpop.f32.mrb[5].mxu1  ;;  %v654_v19 = vpop.f32.mrb[5].mxu0 }
 0x237   : > { %v655_v22 = vadd.f32 %v654_v19, %v525_v18 }
 0x238   : > { %v685_v23 = vadd.f32 %v778_v37, %v660_v15 }
 0x239   : > { %v684_v26 = vadd.f32 %v778_v37, %v655_v22 }
 0x23a   : > { %693 = vst.msk [vmem:[%s1110_s5 + $0x28] sm:$0xff] %vm220_vm0, %v685_v23 }
 0x23b   : > { %692 = vst.msk [vmem:[%s1110_s5 + $0x20] sm:$0xff] %vm220_vm0, %v684_v26 }
 0x23d   : > { %v813_v17 = vpop.f32.mrb[6].mxu1  ;;  %v827_v30 = vpop.f32.mrb[6].mxu0 }
 0x23e   : > { %v670_v31 = vadd.f32 %v827_v30, %v813_v17  ;;  %v535_v32 = vpop.f32.mrb[7].mxu1  ;;  %v664_v33 = vpop.f32.mrb[7].mxu0 }
 0x23f   : > { %v665_v34 = vadd.f32 %v664_v33, %v535_v32 }
 0x240   : > { %v687_v35 = vadd.f32 %v778_v37, %v670_v31 }
 0x241   : > { %v686_v36 = vadd.f32 %v778_v37, %v665_v34 }
 0x242   : > { %695 = vst.msk [vmem:[%s1110_s5 + $0x38] sm:$0xff] %vm220_vm0, %v687_v35 }
 0x243   : > { %694 = vst.msk [vmem:[%s1110_s5 + $0x30] sm:$0xff] %vm220_vm0, %v686_v36 }
 0x244 PF: > { %s14_s15 = sadd.s32 1, %s866_s15  }
 0x245   : > { %p11_p4 = scmp.ge.s32.totalorder %s14_s15, 4  }
 0x247   :  { %13 = sbr.rel (!%p11_p4) target bundleno = 1 (0x1), region = 66 }

</bundles_post_ra>
